<compile_context>
chip_gen: v7x
topology: tpu7x:2x2x1
jax: 0.10.0
libtpu: 0.0.40
codegen_flags: <defaults>
</compile_context>

<pallas_src>
import math
import itertools

import jax
import jax.numpy as jnp
from jax.experimental import pallas as pl
from jax.experimental.pallas import tpu as pltpu


def _make_vcop_kernel(pair_clips, TB, H):
    """pair_clips: static tuple of (clip_i, clip_j) with the shuffle baked in."""

    def kernel(x_ref, w7_ref, b7_ref, w8_ref, b8_ref, out_ref, g_ref, hcat_ref):
        T, _, F = x_ref.shape

        # --- fc7 for every clip in one M-batched MXU matmul -------------------
        # (T*TB, F) @ (F, 2H); the fc7 bias is pre-folded into the second H
        # columns of b7_ref so it lands exactly once per pair.
        x = x_ref[...].reshape(T * TB, F)                               # bf16
        g_ref[...] = (jnp.dot(x, w7_ref[...],
                              preferred_element_type=jnp.float32)
                      + b7_ref[...])                                    # f32 scratch

        # --- per-pair ReLU, lane-concatenated into hcat (TB, P*H) -------------
        # Static unroll (P is small & static); H=512 keeps the writes lane-tile
        # aligned (offsets are multiples of 128).
        for p, (ci, cj) in enumerate(pair_clips):
            h = (g_ref[pl.ds(ci * TB, TB), pl.ds(0, H)]
                 + g_ref[pl.ds(cj * TB, TB), pl.ds(H, H)])
            hcat_ref[:, pl.ds(p * H, H)] = jnp.maximum(h, 0.0).astype(hcat_ref.dtype)
        # TODO(synk): dropout is eval-mode identity (no train-time mask/scale).

        # --- fused fc8: one K = P*H contraction instead of P small dots -------
        logits = jnp.dot(hcat_ref[...], w8_ref[...],
                         preferred_element_type=jnp.float32) + b8_ref[...]

        # --- softmax over lane-padded classes (padded cols carry -1e30 bias) --
        m = jnp.max(logits, axis=-1, keepdims=True)
        e = jnp.exp(logits - m)
        s = jnp.sum(e, axis=-1, keepdims=True)
        inv = pl.reciprocal(s, approx=True)                  # EUP slot (free-ish)
        inv = inv * (2.0 - s * inv)                          # one Newton step -> f32 acc.
        out_ref[...] = (e * inv).astype(out_ref.dtype)

    return kernel


def prepare_vcop_params(perm, w7, b7, w8, b8):
    """One-time parameter repacking (call once, outside the per-forward path)."""
    F2, H = w7.shape
    F = F2 // 2
    HP, C = w8.shape
    T = len(perm)
    P = T * (T - 1) // 2
    assert HP == H * P

    C_pad = -(-C // 128) * 128

    # fc7 decomposition: cat(a,b)@W7 == a@W7[:F] + b@W7[F:]; pack both halves side
    # by side so one (rows, F)@(F, 2H) matmul produces both halves for every clip.
    w7_2 = jnp.concatenate([w7[:F, :], w7[F:, :]], axis=1).astype(jnp.bfloat16)  # (F, 2H)
    # Fold b7 into the second half so each pair picks it up exactly once.
    b7_2h = jnp.concatenate([jnp.zeros((H,), jnp.float32),
                             b7.astype(jnp.float32)]).reshape(1, 2 * H)          # (1, 2H)
    # fc8 stays in its native (P*H, C) pair-major row layout (matches the
    # lane-concatenated hcat); classes padded to a dense 128-wide lane tile.
    w8_p = jnp.pad(w8, ((0, 0), (0, C_pad - C))).astype(jnp.bfloat16)            # (P*H, C_pad)
    b8_p = jnp.pad(b8.reshape(1, C).astype(jnp.float32),
                   ((0, 0), (0, C_pad - C)), constant_values=-1e30)              # (1, C_pad)

    # Static pair -> (clip_i, clip_j) with the shuffle permutation baked in.
    # TODO(synk): PyTorch draws a fresh permutation per call (training-time);
    # here it is a static trace-time constant (a new permutation forces recompile).
    pair_clips = tuple((int(perm[i]), int(perm[j]))
                       for i in range(T) for j in range(i + 1, T))

    return dict(pair_clips=pair_clips, w7_2=w7_2, b7_2h=b7_2h, w8_p=w8_p,
                b8_p=b8_p, T=T, F=F, H=H, P=P, C=C, C_pad=C_pad)


def vcop_head_forward(x, params):
    """x: (B, T, 1, F) float32; params: output of prepare_vcop_params."""
    B, T, _, F = x.shape
    assert T == params["T"] and F == params["F"]
    H, P, C, C_pad = params["H"], params["P"], params["C"], params["C_pad"]
    pair_clips = params["pair_clips"]

    # Batch tiling: sublane-dense (multiple of 16 keeps the bf16 reshape aligned).
    # >= 2 grid steps when the batch allows (v7x megacore), capped at 512 rows/step
    # so single-TC v5e/v6e amortize the ~0.35 us per-step overhead.
    B_pad = -(-max(B, 16) // 16) * 16
    if B_pad >= 32:
        TB = max(16, min(512, (B_pad // 2) // 16 * 16))
    else:
        TB = B_pad
    B_pad = -(-B_pad // TB) * TB

    # Only the activation path stays per-call: transpose to (T, B, F), pad, cast.
    x_tbf = jnp.transpose(x[:, :, 0, :], (1, 0, 2))                 # (T, B, F)
    x_tbf = jnp.pad(x_tbf, ((0, 0), (0, B_pad - B), (0, 0)))
    x_in = x_tbf.astype(jnp.bfloat16)

    # VMEM budget: double-buffered blocks + explicit scratches, with headroom.
    db = 2
    vmem_bytes = (
        db * (T * TB * F * 2            # x block (bf16)
              + F * 2 * H * 2           # w7_2 (bf16)
              + 2 * H * 4               # b7_2h (f32)
              + P * H * C_pad * 2       # w8_p (bf16)
              + C_pad * 4               # b8_p (f32)
              + TB * C_pad * 4)         # out block (f32)
        + T * TB * 2 * H * 4            # g scratch (f32)
        + TB * P * H * 2                # hcat scratch (bf16)
    )
    vmem_limit = min(max(int(vmem_bytes * 1.5) + (4 << 20), 32 << 20), 48 << 20)

    out = pl.pallas_call(
        _make_vcop_kernel(pair_clips, TB, H),
        out_shape=jax.ShapeDtypeStruct((B_pad, C_pad), jnp.float32),
        grid_spec=pltpu.PrefetchScalarGridSpec(
            num_scalar_prefetch=0,
            grid=(B_pad // TB,),
            in_specs=[
                pl.BlockSpec((T, TB, F), lambda b: (0, b, 0)),        # clips (bf16)
                pl.BlockSpec((F, 2 * H), lambda b: (0, 0)),           # repacked fc7 weight
                pl.BlockSpec((1, 2 * H), lambda b: (0, 0)),           # fc7 bias (2nd half only)
                pl.BlockSpec((P * H, C_pad), lambda b: (0, 0)),       # fc8 weight (fused K=P*H)
                pl.BlockSpec((1, C_pad), lambda b: (0, 0)),           # fc8 bias (pad=-1e30)
            ],
            out_specs=pl.BlockSpec((TB, C_pad), lambda b: (b, 0)),
            scratch_shapes=[
                pltpu.VMEM((T * TB, 2 * H), jnp.float32),             # g (fc7 result)
                pltpu.VMEM((TB, P * H), jnp.bfloat16),                # hcat (fc8 operand)
            ],
        ),
        compiler_params=pltpu.CompilerParams(
            dimension_semantics=("parallel",),                        # batch tiles -> 2 TCs on v7x
            vmem_limit_bytes=vmem_limit),
    )(x_in, params["w7_2"], params["b7_2h"], params["w8_p"], params["b8_p"])
    return out[:B, :C]


def reference_forward(x, perm, w7, b7, w8, b8):
    """Pure-JAX reference mirroring the PyTorch forward (eval mode), with the same
    bf16-operand / f32-accumulation policy the kernel uses."""
    B, T, _, F = x.shape
    xb = x.astype(jnp.bfloat16)
    w7b = w7.astype(jnp.bfloat16)
    w8b = w8.astype(jnp.bfloat16)
    f = [xb[:, int(i), 0, :] for i in perm]
    pf = []
    for i in range(T):
        for j in range(i + 1, T):
            cat = jnp.concatenate([f[i], f[j]], axis=-1)
            h = jnp.dot(cat, w7b, preferred_element_type=jnp.float32) + b7
            pf.append(jnp.maximum(h, 0.0).astype(jnp.bfloat16))
    hcat = jnp.concatenate(pf, axis=1)
    logits = jnp.dot(hcat, w8b, preferred_element_type=jnp.float32) + b8
    return jax.nn.softmax(logits, axis=1)


if __name__ == "__main__":
    # Small shapes consistent with the module.
    B = 4                  # batch
    T = 3                  # num_clips (tuple_len)
    F = 32                 # feature_size
    H = 512                # fc7 hidden
    P = T * (T - 1) // 2   # pair_num = 3
    C = math.factorial(T)  # class_num = 6

    key = jax.random.PRNGKey(0)
    kx, k7w, k7b, k8w, k8b = jax.random.split(key, 5)

    # Input: (B, num_clips, 1, feature_size) — matches `tuple[:, i, ...]` + cat(dim=2).
    x = jax.random.normal(kx, (B, T, 1, F), dtype=jnp.float32)

    # Deterministic parameters (scaled so the softmax output has a meaningful spread).
    w7 = 0.10 * jax.random.normal(k7w, (2 * F, H), dtype=jnp.float32)
    b7 = 0.05 * jax.random.normal(k7b, (H,), dtype=jnp.float32)
    w8 = 0.05 * jax.random.normal(k8w, (H * P, C), dtype=jnp.float32)
    b8 = 0.05 * jax.random.normal(k8b, (C,), dtype=jnp.float32)

    # Deterministic stand-in for np.random.permutation(tuple_len).
    perm = (2, 0, 1)
    order_index = list(itertools.permutations(range(T))).index(perm)  # loss-label glue
    del order_index

    # One-time parameter repacking (outside the per-call path).
    params = prepare_vcop_params(perm, w7, b7, w8, b8)

    out = jax.block_until_ready(vcop_head_forward(x, params))
    ref = reference_forward(x, perm, w7, b7, w8, b8)

    assert out.shape == (B, C)
    assert bool(jnp.all(jnp.isfinite(out)))
    assert jnp.allclose(jnp.sum(out, axis=1), 1.0, atol=2e-3)
    assert jnp.allclose(out, ref, atol=2e-3, rtol=2e-2), "mismatch vs JAX reference"

    print("KERNEL_OK")
</pallas_src>

<mosaic_0001>
module attributes {stable_mosaic.version = 11 : i64} {
  func.func @kernel(%arg0: i32, %arg1: memref<3x16x32xbf16, #tpu.memory_space<vmem>>, %arg2: memref<32x1024xbf16, #tpu.memory_space<vmem>>, %arg3: memref<1x1024xf32, #tpu.memory_space<vmem>>, %arg4: memref<1536x128xbf16, #tpu.memory_space<vmem>>, %arg5: memref<1x128xf32, #tpu.memory_space<vmem>>, %arg6: memref<16x128xf32, #tpu.memory_space<vmem>>, %arg7: memref<48x1024xf32, #tpu.memory_space<vmem>>, %arg8: memref<16x1536xbf16, #tpu.memory_space<vmem>>) attributes {dimension_semantics = [#tpu.dimension_semantics<parallel>], iteration_bounds = array<i64: 1>, scalar_prefetch = 0 : i64, scratch_operands = 2 : i64, tpu.core_type = #tpu.core_type<tc>, window_params = [{transform_indices = @transform_0, window_bounds = array<i64: 3, 16, 32>}, {pipeline_mode = #tpu.pipeline_mode<synchronous>, transform_indices = @transform_1, window_bounds = array<i64: 32, 1024>}, {pipeline_mode = #tpu.pipeline_mode<synchronous>, transform_indices = @transform_2, window_bounds = array<i64: 1, 1024>}, {pipeline_mode = #tpu.pipeline_mode<synchronous>, transform_indices = @transform_3, window_bounds = array<i64: 1536, 128>}, {pipeline_mode = #tpu.pipeline_mode<synchronous>, transform_indices = @transform_4, window_bounds = array<i64: 1, 128>}, {transform_indices = @transform_5, window_bounds = array<i64: 16, 128>}]} {
    %c0 = arith.constant 0 : index
    %c0_0 = arith.constant 0 : index
    %c0_1 = arith.constant 0 : index
    %0 = vector.load %arg1[%c0, %c0_0, %c0_1] : memref<3x16x32xbf16, #tpu.memory_space<vmem>>, vector<3x16x32xbf16>
    %1 = vector.shape_cast %0 : vector<3x16x32xbf16> to vector<48x32xbf16>
    %c0_2 = arith.constant 0 : index
    %c0_3 = arith.constant 0 : index
    %2 = vector.load %arg2[%c0_2, %c0_3] : memref<32x1024xbf16, #tpu.memory_space<vmem>>, vector<32x1024xbf16>
    %cst = arith.constant dense<0.000000e+00> : vector<48x1024xf32>
    %3 = tpu.matmul %1, %2, %cst {dimension_numbers = #tpu.dot_dimension_numbers<[1], [0], [0], [1], [0, 0, 1, 1], [], []>} : vector<48x32xbf16>, vector<32x1024xbf16>, vector<48x1024xf32> -> vector<48x1024xf32>
    %c0_4 = arith.constant 0 : index
    %c0_5 = arith.constant 0 : index
    %4 = vector.load %arg3[%c0_4, %c0_5] : memref<1x1024xf32, #tpu.memory_space<vmem>>, vector<1x1024xf32>
    %5 = vector.broadcast %4 : vector<1x1024xf32> to vector<48x1024xf32>
    %6 = arith.addf %3, %5 : vector<48x1024xf32>
    %c0_6 = arith.constant 0 : index
    %c0_7 = arith.constant 0 : index
    %7 = vector.load %arg7[%c0_6, %c0_7] : memref<48x1024xf32, #tpu.memory_space<vmem>>, vector<48x1024xf32>
    tpu.vector_store %arg7[%c0_6, %c0_7], %6 {strides = array<i32>} : memref<48x1024xf32, #tpu.memory_space<vmem>>, vector<48x1024xf32>,
    %c32 = arith.constant 32 : index
    %c0_8 = arith.constant 0 : index
    %8 = vector.load %arg7[%c32, %c0_8] : memref<48x1024xf32, #tpu.memory_space<vmem>>, vector<16x512xf32>
    %c0_9 = arith.constant 0 : index
    %c512 = arith.constant 512 : index
    %9 = vector.load %arg7[%c0_9, %c512] : memref<48x1024xf32, #tpu.memory_space<vmem>>, vector<16x512xf32>
    %10 = arith.addf %8, %9 : vector<16x512xf32>
    %cst_10 = arith.constant 0.000000e+00 : f32
    %11 = vector.broadcast %cst_10 : f32 to vector<16x512xf32>
    %12 = arith.maximumf %10, %11 : vector<16x512xf32>
    %13 = arith.truncf %12 : vector<16x512xf32> to vector<16x512xbf16>
    %c0_11 = arith.constant 0 : index
    %c0_12 = arith.constant 0 : index
    %14 = vector.load %arg8[%c0_11, %c0_12] : memref<16x1536xbf16, #tpu.memory_space<vmem>>, vector<16x512xbf16>
    tpu.vector_store %arg8[%c0_11, %c0_12], %13 {strides = array<i32>} : memref<16x1536xbf16, #tpu.memory_space<vmem>>, vector<16x512xbf16>,
    %c32_13 = arith.constant 32 : index
    %c0_14 = arith.constant 0 : index
    %15 = vector.load %arg7[%c32_13, %c0_14] : memref<48x1024xf32, #tpu.memory_space<vmem>>, vector<16x512xf32>
    %c16 = arith.constant 16 : index
    %c512_15 = arith.constant 512 : index
    %16 = vector.load %arg7[%c16, %c512_15] : memref<48x1024xf32, #tpu.memory_space<vmem>>, vector<16x512xf32>
    %17 = arith.addf %15, %16 : vector<16x512xf32>
    %cst_16 = arith.constant 0.000000e+00 : f32
    %18 = vector.broadcast %cst_16 : f32 to vector<16x512xf32>
    %19 = arith.maximumf %17, %18 : vector<16x512xf32>
    %20 = arith.truncf %19 : vector<16x512xf32> to vector<16x512xbf16>
    %c0_17 = arith.constant 0 : index
    %c512_18 = arith.constant 512 : index
    %21 = vector.load %arg8[%c0_17, %c512_18] : memref<16x1536xbf16, #tpu.memory_space<vmem>>, vector<16x512xbf16>
    tpu.vector_store %arg8[%c0_17, %c512_18], %20 {strides = array<i32>} : memref<16x1536xbf16, #tpu.memory_space<vmem>>, vector<16x512xbf16>,
    %c0_19 = arith.constant 0 : index
    %c0_20 = arith.constant 0 : index
    %22 = vector.load %arg7[%c0_19, %c0_20] : memref<48x1024xf32, #tpu.memory_space<vmem>>, vector<16x512xf32>
    %c16_21 = arith.constant 16 : index
    %c512_22 = arith.constant 512 : index
    %23 = vector.load %arg7[%c16_21, %c512_22] : memref<48x1024xf32, #tpu.memory_space<vmem>>, vector<16x512xf32>
    %24 = arith.addf %22, %23 : vector<16x512xf32>
    %cst_23 = arith.constant 0.000000e+00 : f32
    %25 = vector.broadcast %cst_23 : f32 to vector<16x512xf32>
    %26 = arith.maximumf %24, %25 : vector<16x512xf32>
    %27 = arith.truncf %26 : vector<16x512xf32> to vector<16x512xbf16>
    %c0_24 = arith.constant 0 : index
    %c1024 = arith.constant 1024 : index
    %28 = vector.load %arg8[%c0_24, %c1024] : memref<16x1536xbf16, #tpu.memory_space<vmem>>, vector<16x512xbf16>
    tpu.vector_store %arg8[%c0_24, %c1024], %27 {strides = array<i32>} : memref<16x1536xbf16, #tpu.memory_space<vmem>>, vector<16x512xbf16>,
    %c0_25 = arith.constant 0 : index
    %c0_26 = arith.constant 0 : index
    %29 = vector.load %arg8[%c0_25, %c0_26] : memref<16x1536xbf16, #tpu.memory_space<vmem>>, vector<16x1536xbf16>
    %c0_27 = arith.constant 0 : index
    %c0_28 = arith.constant 0 : index
    %30 = vector.load %arg4[%c0_27, %c0_28] : memref<1536x128xbf16, #tpu.memory_space<vmem>>, vector<1536x128xbf16>
    %cst_29 = arith.constant dense<0.000000e+00> : vector<16x128xf32>
    %31 = tpu.matmul %29, %30, %cst_29 {dimension_numbers = #tpu.dot_dimension_numbers<[1], [0], [0], [1], [0, 0, 1, 1], [], []>} : vector<16x1536xbf16>, vector<1536x128xbf16>, vector<16x128xf32> -> vector<16x128xf32>
    %c0_30 = arith.constant 0 : index
    %c0_31 = arith.constant 0 : index
    %32 = vector.load %arg5[%c0_30, %c0_31] : memref<1x128xf32, #tpu.memory_space<vmem>>, vector<1x128xf32>
    %33 = vector.broadcast %32 : vector<1x128xf32> to vector<16x128xf32>
    %34 = arith.addf %31, %33 : vector<16x128xf32>
    %cst_32 = arith.constant dense<0xFF800000> : vector<16xf32>
    %35 = vector.multi_reduction <maximumf>, %34, %cst_32 [1] : vector<16x128xf32> to vector<16xf32>
    %36 = vector.shape_cast %35 : vector<16xf32> to vector<16x1xf32>
    %37 = vector.broadcast %36 : vector<16x1xf32> to vector<16x128xf32>
    %38 = arith.subf %34, %37 : vector<16x128xf32>
    %39 = math.exp %38 : vector<16x128xf32>
    %cst_33 = arith.constant dense<0.000000e+00> : vector<16xf32>
    %40 = vector.multi_reduction <add>, %39, %cst_33 [1] : vector<16x128xf32> to vector<16xf32>
    %41 = vector.shape_cast %40 : vector<16xf32> to vector<16x1xf32>
    %42 = tpu.reciprocal %41 {approx = true} : vector<16x1xf32> -> vector<16x1xf32>
    %43 = arith.mulf %41, %42 : vector<16x1xf32>
    %cst_34 = arith.constant 2.000000e+00 : f32
    %44 = vector.broadcast %cst_34 : f32 to vector<16x1xf32>
    %45 = arith.subf %44, %43 : vector<16x1xf32>
    %46 = arith.mulf %42, %45 : vector<16x1xf32>
    %47 = vector.broadcast %46 : vector<16x1xf32> to vector<16x128xf32>
    %48 = arith.mulf %39, %47 : vector<16x128xf32>
    %c0_35 = arith.constant 0 : index
    %c0_36 = arith.constant 0 : index
    %49 = vector.load %arg6[%c0_35, %c0_36] : memref<16x128xf32, #tpu.memory_space<vmem>>, vector<16x128xf32>
    tpu.vector_store %arg6[%c0_35, %c0_36], %48 {strides = array<i32>} : memref<16x128xf32, #tpu.memory_space<vmem>>, vector<16x128xf32>,
    return
  }
  func.func @transform_0(%arg0: i32) -> (i32, i32, i32) {
    %c0_i32 = arith.constant 0 : i32
    %c0_i32_0 = arith.constant 0 : i32
    %c0_i32_1 = arith.constant 0 : i32
    return %c0_i32, %arg0, %c0_i32_0 : i32, i32, i32
  }
  func.func @transform_1(%arg0: i32) -> (i32, i32) {
    %c0_i32 = arith.constant 0 : i32
    %c0_i32_0 = arith.constant 0 : i32
    %c0_i32_1 = arith.constant 0 : i32
    return %c0_i32, %c0_i32_0 : i32, i32
  }
  func.func @transform_2(%arg0: i32) -> (i32, i32) {
    %c0_i32 = arith.constant 0 : i32
    %c0_i32_0 = arith.constant 0 : i32
    %c0_i32_1 = arith.constant 0 : i32
    return %c0_i32, %c0_i32_0 : i32, i32
  }
  func.func @transform_3(%arg0: i32) -> (i32, i32) {
    %c0_i32 = arith.constant 0 : i32
    %c0_i32_0 = arith.constant 0 : i32
    %c0_i32_1 = arith.constant 0 : i32
    return %c0_i32, %c0_i32_0 : i32, i32
  }
  func.func @transform_4(%arg0: i32) -> (i32, i32) {
    %c0_i32 = arith.constant 0 : i32
    %c0_i32_0 = arith.constant 0 : i32
    %c0_i32_1 = arith.constant 0 : i32
    return %c0_i32, %c0_i32_0 : i32, i32
  }
  func.func @transform_5(%arg0: i32) -> (i32, i32) {
    %c0_i32 = arith.constant 0 : i32
    %c0_i32_0 = arith.constant 0 : i32
    return %arg0, %c0_i32 : i32, i32
  }
}

</mosaic_0001>

<bundles_post_ra>
// kernel: tpu_custom_call.1
= control target key start
LH: loop header
LB: loop body
LE: loop exit
PB: predicated region body
PF: predicated region fallthrough
CT: control target
= control target key end

     0   :  { %10 = vsyncpa [#allocation5], 0  ;;  %s2485_s0 = inlined_call_operand.hbm [shape: bf16[3,16,32], index: 0, kind: input, shape index: {}]   ;;  %s2486_s1 = inlined_call_operand.hbm [shape: bf16[32,1024], index: 1, kind: input, shape index: {}]   ;;  %s2487_s2 = inlined_call_operand.hbm [shape: f32[1,1024], index: 2, kind: input, shape index: {}]   ;;  %s2488_s3 = inlined_call_operand.hbm [shape: bf16[1536,128], index: 3, kind: input, shape index: {}]   ;;  %s2489_s4 = inlined_call_operand.vmem [shape: f32[1,128], index: 4, kind: input, shape index: {}]   ;;  %s2490_s5 = inlined_call_operand.hbm [shape: f32[16,128], index: 5, kind: output, shape index: {}]  }
   0x1   :  { %11 = vsyncpa [#allocation8], 0 }
   0x2   :  { %12 = vsyncpa [#allocation11], 0 }
   0x3   :  { %13 = vsyncpa [#allocation6], 0  ;;  %s2239_s18 = smov [#allocation7]   ;;  %s2121_s22 = scalar_lea.hbm %s2486_s1, 2048 }
   0x4   :  { %s31_s19 = sshll.u32 %s2239_s18, 4  ;;  %p2122_p0 = scmp.ne.s32.totalorder %s2486_s1, %s2121_s22  ;;  %s32_s19 = int_to_ptr.vmem [resolvable:$true] %s31_s19 }
   0x5   :  { %p2125_p1 = scmp.lt.u32.totalorder %s2121_s22, %s2486_s1 }
   0x7   :  { %p2127_p2 = pnand %p2125_p1, %p2122_p0 }
   0x9   :  { %2130 = shalt.err (!%p2127_p2)
}
   0xa   :  { %s2131_s27 = scalar_lea.vmem %s32_s19, 2048  ;;  %p2136_p4 = scmp.lt.s32.totalorder %s32_s19, %s32_s19 }
   0xb   :  { %p2132_p3 = scmp.ne.s32.totalorder %s32_s19, %s2131_s27  ;;  %p2137_p5 = scmp.lt.s32.totalorder %s2131_s27, %s2131_s27 }
   0xd   :  { %p2138_p6 = por %p2137_p5, %p2136_p4 }
   0xf   :  { %p2139_p7 = pnand %p2138_p6, %p2132_p3 }
  0x11   :  { %2142 = shalt.err (!%p2139_p7)
}
  0x12   :  { %s2240_s28 = smov 512   ;;  %s2241_s29 = smov 32  }
  0x13   :  { %37 = dma.hbm_to_vmem [thread:$0]  %s2486_s1, 2048, %s32_s19, [#allocation8], %s2240_s28, %s2240_s28, %s2241_s29  }
  0x14   :  { %s2242_s7 = smov [#allocation4]   ;;  %s2143_s11 = scalar_lea.hbm %s2485_s0, 384 }
  0x15   :  { %s19_s8 = sshll.u32 %s2242_s7, 4  ;;  %p2144_p8 = scmp.ne.s32.totalorder %s2485_s0, %s2143_s11  ;;  %s20_s8 = int_to_ptr.vmem [resolvable:$true] %s19_s8 }
  0x16   :  { %p2147_p9 = scmp.lt.u32.totalorder %s2143_s11, %s2485_s0 }
  0x18   :  { %p2149_p10 = pnand %p2147_p9, %p2144_p8 }
  0x1a   :  { %2152 = shalt.err (!%p2149_p10)
}
  0x1b   :  { %s2153_s16 = scalar_lea.vmem %s20_s8, 384  ;;  %p2158_p12 = scmp.lt.s32.totalorder %s20_s8, %s20_s8 }
  0x1c   :  { %p2154_p11 = scmp.ne.s32.totalorder %s20_s8, %s2153_s16  ;;  %p2159_p13 = scmp.lt.s32.totalorder %s2153_s16, %s2153_s16 }
  0x1e   :  { %p2160_p0 = por %p2159_p13, %p2158_p12 }
  0x20   :  { %p2161_p1 = pnand %p2160_p0, %p2154_p11 }
  0x22   :  { %2164 = shalt.err (!%p2161_p1)
}
  0x23   :  { %s2243_s1 = smov 64   ;;  %s2244_s17 = smov 4  }
  0x24   :  { %25 = dma.hbm_to_vmem [thread:$0]  %s2485_s0, 384, %s20_s8, [#allocation5], %s2243_s1, %s2243_s1, %s2244_s17  }
  0x25   :  { %s2245_s20 = smov [#allocation9]   ;;  %s2246_s22 = smov [#allocation10]  }
  0x26   :  { %s44_s21 = sshll.u32 %s2245_s20, 4  ;;  %s53_s23 = sshll.u32 %s2246_s22, 4  ;;  %s45_s21 = int_to_ptr.vmem [resolvable:$true] %s44_s21  ;;  %s2308_s23 = int_to_ptr.vmem [resolvable:$true] %s53_s23 }
  0x27   :  { %s2165_s26 = scalar_lea.hbm %s2487_s2, 128 }
  0x28   :  { %p2166_p2 = scmp.ne.s32.totalorder %s2487_s2, %s2165_s26  ;;  %p2169_p3 = scmp.lt.u32.totalorder %s2165_s26, %s2487_s2 }
  0x2a   :  { %p2171_p4 = pnand %p2169_p3, %p2166_p2 }
  0x2c   :  { %2174 = shalt.err (!%p2171_p4)
}
  0x2d   :  { %s2175_s0 = scalar_lea.vmem %s45_s21, 128  ;;  %p2180_p6 = scmp.lt.s32.totalorder %s45_s21, %s45_s21 }
  0x2e   :  { %p2176_p5 = scmp.ne.s32.totalorder %s45_s21, %s2175_s0  ;;  %p2181_p7 = scmp.lt.s32.totalorder %s2175_s0, %s2175_s0 }
  0x30   :  { %p2182_p8 = por %p2181_p7, %p2180_p6 }
  0x32   :  { %p2183_p9 = pnand %p2182_p8, %p2176_p5 }
  0x34   :  { %2186 = shalt.err (!%p2183_p9)
}
  0x35   :  { %47 = dma.hbm_to_vmem [thread:$0]  %s2487_s2, 128, %s45_s21, [#allocation8]  }
  0x36   :  { %s2187_s10 = scalar_lea.hbm %s2488_s3, 12288 }
  0x37   :  { %p2188_p10 = scmp.ne.s32.totalorder %s2488_s3, %s2187_s10  ;;  %p2191_p11 = scmp.lt.u32.totalorder %s2187_s10, %s2488_s3 }
  0x39   :  { %p2193_p12 = pnand %p2191_p11, %p2188_p10 }
  0x3b   :  { %2196 = shalt.err (!%p2193_p12)
}
  0x3c   :  { %s2197_s15 = scalar_lea.vmem %s2308_s23, 12288  ;;  %p2202_p0 = scmp.lt.s32.totalorder %s2308_s23, %s2308_s23 }
  0x3d   :  { %p2198_p13 = scmp.ne.s32.totalorder %s2308_s23, %s2197_s15  ;;  %p2203_p1 = scmp.lt.s32.totalorder %s2197_s15, %s2197_s15 }
  0x3f   :  { %p2204_p2 = por %p2203_p1, %p2202_p0 }
  0x41   :  { %p2205_p3 = pnand %p2204_p2, %p2198_p13 }
  0x43   :  { %2208 = shalt.err (!%p2205_p3)
}
  0x44   :  { %59 = dma.hbm_to_vmem [thread:$0]  %s2488_s3, 12288, %s2308_s23, [#allocation11], %s2243_s1, %s2243_s1, %s2244_s17  }
  0x45   :  { %2231 = dma.done.wait [#allocation5], 384  }
  0x46   :  { %2232 = vsyncadd [#allocation5], 4294966912 }
  0x47   :  { %2233 = dma.done.wait [#allocation8], 2176  }
  0x48   :  { %2234 = vsyncadd [#allocation8], 4294965120 }
  0x49   :  { %2235 = dma.done.wait [#allocation11], 12288  }
  0x4a   :  { %2236 = vsyncadd [#allocation11], 4294955008  ;;  %v2247_v0 = vmov 0   ;;  %v81_v1 = vld [vmem:[#allocation7] sm:$0xff]  ;;  %v82_v3 = vld [vmem:[#allocation7 + $0x8] sm:$0xff]  ;;  %vm234_vm0 = vcmask 261120  }
  0x4b   :  { %276 = vmatprep.mubr.bf16.mxu0 %v2247_v0  ;;  %339 = vmatprep.mubr.bf16.mxu1 %v2247_v0  ;;  %v85_v2 = vld [vmem:[#allocation7 + $0x20] sm:$0xff]  ;;  %v86_v5 = vld [vmem:[#allocation7 + $0x28] sm:$0xff]  ;;  %v83_v15 = vld [vmem:[#allocation7 + $0x10] sm:$0xff] }
  0x4c   :  { %v1746_v4 = vcombine.high %v81_v1, %v85_v2  ;;  %v1745_v6 = vcombine.low %v81_v1, %v85_v2  ;;  %v89_v7 = vld [vmem:[#allocation7 + $0x40] sm:$0xff]  ;;  %v1748_v9 = vcombine.high %v82_v3, %v86_v5  ;;  %v1747_v10 = vcombine.low %v82_v3, %v86_v5  ;;  %v90_v12 = vld [vmem:[#allocation7 + $0x48] sm:$0xff]  ;;  %v87_v17 = vld [vmem:[#allocation7 + $0x30] sm:$0xff] }
  0x4d   :  { %v93_v8 = vld [vmem:[#allocation7 + $0x60] sm:$0xff]  ;;  %v94_v13 = vld [vmem:[#allocation7 + $0x68] sm:$0xff]  ;;  %v84_v18 = vld [vmem:[#allocation7 + $0x18] sm:$0xff]  ;;  %v1750_v21 = vcombine.high %v83_v15, %v87_v17  ;;  %v1749_v26 = vcombine.low %v83_v15, %v87_v17 }
  0x4e   :  { %v1754_v11 = vcombine.high %v89_v7, %v93_v8  ;;  %244 = vmatprep.subr.bf16.mxu0 %v1746_v4  ;;  %v1756_v14 = vcombine.high %v90_v12, %v94_v13  ;;  %307 = vmatprep.subr.bf16.mxu1 %v1748_v9  ;;  %v1753_v16 = vcombine.low %v89_v7, %v93_v8  ;;  %v88_v19 = vld [vmem:[#allocation7 + $0x38] sm:$0xff]  ;;  %v2014_v22 = vld [vmem:[#allocation4] sm:$0xff]   ;;  %v91_v24 = vld [vmem:[#allocation7 + $0x50] sm:$0xff] }
  0x4f   :  { %245 = vmatpush1.bf16.msra.mxu0 %v1745_v6  ;;  %308 = vmatpush1.bf16.msra.mxu1 %v1747_v10  ;;  %v1755_v20 = vcombine.low %v90_v12, %v94_v13  ;;  %v1752_v23 = vcombine.high %v84_v18, %v88_v19  ;;  %v95_v25 = vld [vmem:[#allocation7 + $0x70] sm:$0xff]  ;;  %v92_v27 = vld [vmem:[#allocation7 + $0x58] sm:$0xff]  ;;  %v1751_v29 = vcombine.low %v84_v18, %v88_v19  ;;  %v2017_v36 = vld [vmem:[#allocation10 + $0x40] sm:$0xff]   ;;  %v99_v6 = vlaneseq }
  0x50   :  { %246 = vmatprep.subr.bf16.mxu0 %v1754_v11  ;;  %309 = vmatprep.subr.bf16.mxu1 %v1756_v14  ;;  %v96_v28 = vld [vmem:[#allocation7 + $0x78] sm:$0xff]  ;;  %v1758_v30 = vcombine.high %v91_v24, %v95_v25  ;;  %v1757_v32 = vcombine.low %v91_v24, %v95_v25  ;;  %v2015_v33 = vld [vmem:[#allocation4 + $0x8] sm:$0xff]   ;;  %v2018_v37 = vld [vmem:[#allocation10 + $0xc0] sm:$0xff]  }
  0x51   :  { %v1760_v31 = vcombine.high %v92_v27, %v96_v28  ;;  %v1759_v34 = vcombine.low %v92_v27, %v96_v28  ;;  %v2016_v35 = vld [vmem:[#allocation4 + $0x10] sm:$0xff]   ;;  %v2019_v38 = vld [vmem:[#allocation10] sm:$0xff]   ;;  %v2021_v40 = vld [vmem:[#allocation10 + $0x48] sm:$0xff]   ;;  %v100_v7 = vshrl.u32 %v99_v6, 7 }
  0x52   :  { %v2020_v39 = vld [vmem:[#allocation10 + $0x80] sm:$0xff]   ;;  %v2022_v41 = vld [vmem:[#allocation10 + $0xc8] sm:$0xff]   ;;  %v2025_v44 = vld [vmem:[#allocation10 + $0x50] sm:$0xff]  }
  0x53   :  { %247 = vmatpush1.bf16.msra.mxu0 %v1753_v16  ;;  %310 = vmatpush1.bf16.msra.mxu1 %v1755_v20  ;;  %v2023_v42 = vld [vmem:[#allocation10 + $0x8] sm:$0xff]   ;;  %v2026_v45 = vld [vmem:[#allocation10 + $0xd0] sm:$0xff]   ;;  %v2029_v48 = vld [vmem:[#allocation10 + $0x58] sm:$0xff]   ;;  %v101_v8 = vsub.s32 0, %v100_v7  ;;  %v109_v10 = vsub.s32 2, %v100_v7 }
  0x54   :  { %370 = vmatprep.subr.bf16.mxu0 %v1750_v21  ;;  %433 = vmatprep.subr.bf16.mxu1 %v1752_v23  ;;  %v2024_v43 = vld [vmem:[#allocation10 + $0x88] sm:$0xff]   ;;  %v2027_v46 = vld [vmem:[#allocation10 + $0x10] sm:$0xff]   ;;  %v2030_v49 = vld [vmem:[#allocation10 + $0xd8] sm:$0xff]  }
  0x55   :  { %v2028_v47 = vld [vmem:[#allocation10 + $0x90] sm:$0xff]   ;;  %v2031_v50 = vld [vmem:[#allocation10 + $0x18] sm:$0xff]   ;;  %v2033_v52 = vld [vmem:[#allocation10 + $0x60] sm:$0xff]  }
  0x56   :  { %1761 = vmatmul.mubr.msk.bf16.vlgmr.msra.gmra.mrb[0].mxu0 %vm234_vm0, %v2014_v22  ;;  %1764 = vmatmul.mubr.msk.bf16.vlgmr.msra.gmra.mrb[0].mxu1 %vm234_vm0, %v2014_v22  ;;  %v2032_v51 = vld [vmem:[#allocation10 + $0x98] sm:$0xff]   ;;  %v2034_v53 = vld [vmem:[#allocation10 + $0xe0] sm:$0xff]   ;;  %v2037_v56 = vld [vmem:[#allocation10 + $0x68] sm:$0xff]  }
  0x57   :  { %371 = vmatpush1.bf16.msra.mxu0 %v1749_v26  ;;  %434 = vmatpush1.bf16.msra.mxu1 %v1751_v29  ;;  %v2035_v54 = vld [vmem:[#allocation10 + $0x20] sm:$0xff]   ;;  %v2038_v57 = vld [vmem:[#allocation10 + $0xe8] sm:$0xff]   ;;  %v2041_v60 = vld [vmem:[#allocation10 + $0x70] sm:$0xff]  }
  0x58   :  { %286 = vmatprep.mubr.bf16.mxu0 %v2247_v0  ;;  %349 = vmatprep.mubr.bf16.mxu1 %v2247_v0  ;;  %v2036_v55 = vld [vmem:[#allocation10 + $0xa0] sm:$0xff]   ;;  %v2039_v58 = vld [vmem:[#allocation10 + $0x28] sm:$0xff]   ;;  %v2042_v61 = vld [vmem:[#allocation10 + $0xf0] sm:$0xff]  }
  0x59   :  { %372 = vmatprep.subr.bf16.mxu0 %v1758_v30  ;;  %435 = vmatprep.subr.bf16.mxu1 %v1760_v31  ;;  %v2040_v59 = vld [vmem:[#allocation10 + $0xa8] sm:$0xff]   ;;  %v2043_v62 = vld [vmem:[#allocation10 + $0x30] sm:$0xff]   ;;  %v2046_v1 = vld [vmem:[#allocation10 + $0xf8] sm:$0xff]  }
  0x5a   :  { %v2044_v63 = vld [vmem:[#allocation10 + $0xb0] sm:$0xff]   ;;  %v2047_v2 = vld [vmem:[#allocation10 + $0x38] sm:$0xff]   ;;  %v2049_v4 = vld [vmem:[#allocation10 + $0x140] sm:$0xff]  }
  0x5b   :  { %373 = vmatpush1.bf16.msra.mxu0 %v1757_v32  ;;  %436 = vmatpush1.bf16.msra.mxu1 %v1759_v34  ;;  %v2048_v3 = vld [vmem:[#allocation10 + $0xb8] sm:$0xff]   ;;  %v2050_v5 = vld [vmem:[#allocation10 + $0x1c0] sm:$0xff]  }
  0x5c   :  { %1870 = vmatprep.subr.bf16.mxu0 %v2017_v36  ;;  %1892 = vmatprep.subr.bf16.mxu1 %v2018_v37  ;;  %v97_v9 = vld [vmem:[#allocation9] sm:$0xff]  ;;  %v117_v36 = vsub.s32 4, %v100_v7 }
  0x5d   :  { %v102_v11 = vrot.slane %v97_v9, %v101_v8  ;;  %v110_v12 = vrot.slane %v97_v9, %v109_v10 }
  0x5e   :  { %1762 = vmatmul.mubr.msk.bf16.gmra.mrb[4].mxu0 %vm234_vm0, %v2015_v33  ;;  %1765 = vmatmul.mubr.msk.bf16.gmra.mrb[4].mxu1 %vm234_vm0, %v2015_v33 }
  0x5f   :  { %296 = vmatprep.mubr.bf16.mxu0 %v2247_v0  ;;  %359 = vmatprep.mubr.bf16.mxu1 %v2247_v0 }
  0x66   :  { %1763 = vmatmul.mubr.msk.bf16.gmra.mrb[8].mxu0 %vm234_vm0, %v2016_v35  ;;  %1766 = vmatmul.mubr.msk.bf16.gmra.mrb[8].mxu1 %vm234_vm0, %v2016_v35 }
  0x67   :  { %402 = vmatprep.mubr.bf16.mxu0 %v2247_v0  ;;  %465 = vmatprep.mubr.bf16.mxu1 %v2247_v0 }
  0x6e   :  { %1767 = vmatmul.mubr.msk.bf16.vlgmr.msra.gmra.mrb[12].mxu0 %vm234_vm0, %v2014_v22  ;;  %1770 = vmatmul.mubr.msk.bf16.vlgmr.msra.gmra.mrb[12].mxu1 %vm234_vm0, %v2014_v22 }
  0x6f   :  { %412 = vmatprep.mubr.bf16.mxu0 %v2247_v0  ;;  %475 = vmatprep.mubr.bf16.mxu1 %v2247_v0 }
  0x70   :  { %1871 = vmatpush3.bf16.msra.mxu0 %v2019_v38  ;;  %1893 = vmatpush3.bf16.msra.mxu1 %v2020_v39  ;;  %v125_v39 = vsub.s32 6, %v100_v7 }
  0x71   :  { %1872 = vmatprep.subr.bf16.mxu0 %v2021_v40  ;;  %1894 = vmatprep.subr.bf16.mxu1 %v2022_v41  ;;  %v121_v40 = vsub.s32 5, %v100_v7  ;;  %v105_v41 = vsub.s32 1, %v100_v7 }
  0x74   :  { %1873 = vmatpush3.bf16.msra.mxu0 %v2023_v42  ;;  %1895 = vmatpush3.bf16.msra.mxu1 %v2024_v43  ;;  %v113_v42 = vsub.s32 3, %v100_v7 }
  0x75   :  { %1874 = vmatprep.subr.bf16.mxu0 %v2025_v44  ;;  %1896 = vmatprep.subr.bf16.mxu1 %v2026_v45  ;;  %v129_v45 = vsub.s32 7, %v100_v7 }
  0x76   :  { %1768 = vmatmul.mubr.msk.bf16.gmra.mrb[16].mxu0 %vm234_vm0, %v2015_v33  ;;  %1771 = vmatmul.mubr.msk.bf16.gmra.mrb[16].mxu1 %vm234_vm0, %v2015_v33 }
  0x77   :  { %422 = vmatprep.mubr.bf16.mxu0 %v2247_v0  ;;  %485 = vmatprep.mubr.bf16.mxu1 %v2247_v0  ;;  %v2045_v0 = vld [vmem:[#allocation10 + $0x78] sm:$0xff]  }
  0x78   :  { %1875 = vmatpush3.bf16.msra.mxu0 %v2027_v46  ;;  %1897 = vmatpush3.bf16.msra.mxu1 %v2028_v47  ;;  %v118_v47 = vrot.slane %v97_v9, %v117_v36 }
  0x79   :  { %1876 = vmatprep.subr.bf16.mxu0 %v2029_v48  ;;  %1898 = vmatprep.subr.bf16.mxu1 %v2030_v49  ;;  %v2382_v48 = vrot.slane %v97_v9, %v125_v39  ;;  %v2384_v49 = vrot.slane %v97_v9, %v121_v40 }
  0x7c   :  { %1877 = vmatpush3.bf16.msra.mxu0 %v2031_v50  ;;  %1899 = vmatpush3.bf16.msra.mxu1 %v2032_v51  ;;  %v2386_v50 = vrot.slane %v97_v9, %v105_v41  ;;  %v2388_v51 = vrot.slane %v97_v9, %v113_v42 }
  0x7d   :  { %1878 = vmatprep.subr.bf16.mxu0 %v2033_v52  ;;  %1900 = vmatprep.subr.bf16.mxu1 %v2034_v53  ;;  %v2390_v52 = vrot.slane %v97_v9, %v129_v45 }
  0x7e   :  { %1769 = vmatmul.mubr.msk.bf16.gmra.mrb[20].mxu0 %vm234_vm0, %v2016_v35  ;;  %1772 = vmatmul.mubr.msk.bf16.gmra.mrb[20].mxu1 %vm234_vm0, %v2016_v35 }
  0x80   :  { %1879 = vmatpush3.bf16.msra.mxu0 %v2035_v54  ;;  %1901 = vmatpush3.bf16.msra.mxu1 %v2036_v55 }
  0x81   :  { %1880 = vmatprep.subr.bf16.mxu0 %v2037_v56  ;;  %1902 = vmatprep.subr.bf16.mxu1 %v2038_v57 }
  0x84   :  { %1881 = vmatpush3.bf16.msra.mxu0 %v2039_v58  ;;  %1903 = vmatpush3.bf16.msra.mxu1 %v2040_v59 }
  0x85   :  { %1882 = vmatprep.subr.bf16.mxu0 %v2041_v60  ;;  %1904 = vmatprep.subr.bf16.mxu1 %v2042_v61 }
  0x88   :  { %1883 = vmatpush3.bf16.msra.mxu0 %v2043_v62  ;;  %1905 = vmatpush3.bf16.msra.mxu1 %v2044_v63 }
  0x89   :  { %1884 = vmatprep.subr.bf16.mxu0 %v2045_v0  ;;  %1906 = vmatprep.subr.bf16.mxu1 %v2046_v1 }
  0x8c   :  { %1885 = vmatpush3.bf16.msra.mxu0 %v2047_v2  ;;  %1907 = vmatpush3.bf16.msra.mxu1 %v2048_v3 }
  0x8d   :  { %1914 = vmatprep.subr.bf16.mxu0 %v2049_v4  ;;  %1936 = vmatprep.subr.bf16.mxu1 %v2050_v5 }
 0x129   :  { %v278_v13 = vpop.f32.mrb[0].mxu0  ;;  %v341_v15 = vpop.f32.mrb[0].mxu1 }
 0x12a   :  { %v2366_v14 = vadd.f32 %v278_v13, %v102_v11  ;;  %v2368_v16 = vpop.f32.mrb[1].mxu0  ;;  %v2370_v17 = vadd.f32 %v341_v15, %v110_v12  ;;  %v2372_v18 = vpop.f32.mrb[1].mxu1 }
 0x12b   :  { %v282_v19 = vpop.f32.mrb[2].mxu0  ;;  %v345_v21 = vpop.f32.mrb[2].mxu1 }
 0x12c   :  { %v2374_v20 = vadd.f32 %v282_v19, %v102_v11  ;;  %v2376_v22 = vpop.f32.mrb[3].mxu0  ;;  %v2378_v23 = vadd.f32 %v345_v21, %v110_v12  ;;  %v2380_v24 = vpop.f32.mrb[3].mxu1 }
 0x131   :  { %v288_v25 = vpop.f32.mrb[4].mxu0  ;;  %v351_v26 = vpop.f32.mrb[4].mxu1 }
 0x132   :  { %v290_v27 = vpop.f32.mrb[5].mxu0  ;;  %v353_v28 = vpop.f32.mrb[5].mxu1 }
 0x133   :  { %v292_v29 = vpop.f32.mrb[6].mxu0  ;;  %v355_v30 = vpop.f32.mrb[6].mxu1  ;;  %v281_v28 = vadd.f32 %v2368_v16, %v2386_v50 }
 0x134   :  { %v294_v31 = vpop.f32.mrb[7].mxu0  ;;  %v357_v32 = vpop.f32.mrb[7].mxu1 }
 0x139   :  { %v298_v33 = vpop.f32.mrb[8].mxu0  ;;  %v361_v34 = vpop.f32.mrb[8].mxu1 }
 0x13a   :  { %v300_v35 = vpop.f32.mrb[9].mxu0  ;;  %v363_v37 = vpop.f32.mrb[9].mxu1  ;;  %v299_v53 = vadd.f32 %v298_v33, %v102_v11  ;;  %v362_v55 = vadd.f32 %v361_v34, %v110_v12 }
 0x13b   :  { %v302_v38 = vpop.f32.mrb[10].mxu0  ;;  %v365_v43 = vpop.f32.mrb[10].mxu1  ;;  %v301_v56 = vadd.f32 %v300_v35, %v2386_v50  ;;  %v2394_v57 = vadd.f32 %v363_v37, %v2388_v51  ;;  %v344_v37 = vadd.f32 %v2372_v18, %v2388_v51 }
 0x13c   :  { %v304_v44 = vpop.f32.mrb[11].mxu0  ;;  %v367_v46 = vpop.f32.mrb[11].mxu1  ;;  %v2396_v61 = vadd.f32 %v302_v38, %v102_v11  ;;  %v2398_v62 = vadd.f32 %v365_v43, %v110_v12 }
 0x13d   :  { %v2403_v3 = vadd.f32 %v304_v44, %v2386_v50  ;;  %v2409_v15 = vadd.f32 %v367_v46, %v2388_v51 }
 0x141   :  { %v404_v54 = vpop.f32.mrb[12].mxu0  ;;  %v467_v59 = vpop.f32.mrb[12].mxu1 }
 0x142   :  { %v405_v58 = vadd.f32 %v404_v54, %v118_v47  ;;  %v406_v60 = vpop.f32.mrb[13].mxu0  ;;  %v468_v63 = vadd.f32 %v467_v59, %v2382_v48  ;;  %v469_v1 = vpop.f32.mrb[13].mxu1 }
 0x143   :  { %v407_v0 = vadd.f32 %v406_v60, %v2384_v49  ;;  %v408_v2 = vpop.f32.mrb[14].mxu0  ;;  %v470_v5 = vadd.f32 %v469_v1, %v2390_v52  ;;  %v471_v7 = vpop.f32.mrb[14].mxu1 }
 0x144   :  { %v560_v4 = vadd.f32 %v405_v58, %v299_v53  ;;  %v409_v6 = vadd.f32 %v408_v2, %v118_v47  ;;  %v410_v8 = vpop.f32.mrb[15].mxu0  ;;  %v562_v9 = vadd.f32 %v468_v63, %v362_v55  ;;  %v472_v11 = vadd.f32 %v471_v7, %v2382_v48  ;;  %v473_v13 = vpop.f32.mrb[15].mxu1  ;;  %v2051_v58 = vld [vmem:[#allocation10 + $0x100] sm:$0xff]   ;;  %v2053_v2 = vld [vmem:[#allocation10 + $0x148] sm:$0xff]  }
 0x145   :  { %v561_v10 = vadd.f32 %v407_v0, %v301_v56  ;;  %v411_v12 = vadd.f32 %v410_v8, %v2384_v49  ;;  %v563_v19 = vadd.f32 %v470_v5, %v2394_v57  ;;  %v474_v25 = vadd.f32 %v473_v13, %v2390_v52 }
 0x146   :  { %v564_v21 = vadd.f32 %v409_v6, %v2396_v61  ;;  %v566_v26 = vadd.f32 %v472_v11, %v2398_v62  ;;  %v568_v29 = vmax.f32 %v560_v4, 0.0  ;;  %v570_v32 = vmax.f32 %v562_v9, 0.0 }
 0x147   :  { %v565_v27 = vadd.f32 %v411_v12, %v2403_v3  ;;  %v567_v31 = vadd.f32 %v474_v25, %v2409_v15  ;;  %v569_v33 = vmax.f32 %v561_v10, 0.0  ;;  %v2057_v25 = vld [vmem:[#allocation10 + $0x150] sm:$0xff]  }
 0x148   :  { %v572_v30 = vmax.f32 %v564_v21, 0.0  ;;  %v574_v34 = vmax.f32 %v566_v26, 0.0  ;;  %v2055_v21 = vld [vmem:[#allocation10 + $0x108] sm:$0xff]  }
 0x149   :  { %v573_v35 = vmax.f32 %v565_v27, 0.0  ;;  %v414_v36 = vpop.f32.mrb[16].mxu0  ;;  %v575_v39 = vmax.f32 %v567_v31, 0.0  ;;  %v477_v41 = vpop.f32.mrb[16].mxu1 }
 0x14a   :  { %v576_v38 = vpack.c.bf16 %v572_v30, %v568_v29  ;;  %v415_v40 = vadd.f32 %v414_v36, %v118_v47  ;;  %v416_v42 = vpop.f32.mrb[17].mxu0  ;;  %v578_v43 = vpack.c.bf16 %v574_v34, %v570_v32  ;;  %v478_v16 = vadd.f32 %v477_v41, %v2382_v48  ;;  %v479_v45 = vpop.f32.mrb[17].mxu1 }
 0x14b   :  { %v417_v44 = vadd.f32 %v416_v42, %v2384_v49  ;;  %v418_v46 = vpop.f32.mrb[18].mxu0  ;;  %v577_v54 = vpack.c.bf16 %v573_v35, %v569_v33  ;;  %v480_v63 = vadd.f32 %v479_v45, %v2390_v52  ;;  %v481_v0 = vpop.f32.mrb[18].mxu1 }
 0x14c   :  { %v600_v59 = vadd.f32 %v415_v40, %v299_v53  ;;  %v640_v60 = vadd.f32 %v415_v40, %v2366_v14  ;;  %v419_v18 = vadd.f32 %v418_v46, %v118_v47  ;;  %v420_v1 = vpop.f32.mrb[19].mxu0  ;;  %v2425_v4 = vadd.f32 %v478_v16, %v362_v55  ;;  %v483_v8 = vpop.f32.mrb[19].mxu1 }
 0x14d   :  { %v2428_v5 = vadd.f32 %v478_v16, %v2370_v17  ;;  %v2430_v6 = vadd.f32 %v417_v44, %v301_v56  ;;  %v2432_v7 = vadd.f32 %v417_v44, %v281_v28  ;;  %1483 = vmatprep.mubr.bf16.mxu0 %v577_v54  ;;  %v285_v14 = vadd.f32 %v2376_v22, %v2386_v50  ;;  %v2052_v50 = vld [vmem:[#allocation10 + $0x180] sm:$0xff]  }
 0x14e   :  { %v2437_v53 = vadd.f32 %v480_v63, %v2394_v57  ;;  %v2439_v47 = vadd.f32 %v480_v63, %v344_v37  ;;  %1484 = vmatmul.mubr.bf16.vlgmr.msra.gmra.mrb[24].mxu0 %v576_v38  ;;  %v348_v55 = vadd.f32 %v2380_v24, %v2388_v51  ;;  %v571_v17 = vmax.f32 %v563_v19, 0.0  ;;  %v2054_v19 = vld [vmem:[#allocation10 + $0x1c8] sm:$0xff]  }
 0x14f   :  { %v608_v9 = vmax.f32 %v600_v59, 0.0  ;;  %v648_v56 = vmax.f32 %v640_v60, 0.0  ;;  %1915 = vmatpush3.bf16.msra.mxu0 %v2051_v58  ;;  %v610_v10 = vmax.f32 %v2425_v4, 0.0  ;;  %v650_v11 = vmax.f32 %v2428_v5, 0.0  ;;  %v2059_v59 = vld [vmem:[#allocation10 + $0x110] sm:$0xff]   ;;  %v2063_v4 = vld [vmem:[#allocation10 + $0x118] sm:$0xff]  }
 0x150   :  { %v604_v12 = vadd.f32 %v419_v18, %v2396_v61  ;;  %v644_v22 = vadd.f32 %v419_v18, %v2374_v20  ;;  %1916 = vmatprep.subr.bf16.mxu0 %v2053_v2  ;;  %v482_v57 = vadd.f32 %v481_v0, %v2382_v48  ;;  %v421_v13 = vadd.f32 %v420_v1, %v2384_v49  ;;  %v2061_v18 = vld [vmem:[#allocation10 + $0x158] sm:$0xff]   ;;  %v2060_v1 = vld [vmem:[#allocation10 + $0x190] sm:$0xff]   ;;  %v2065_v5 = vld [vmem:[#allocation10 + $0x160] sm:$0xff]  }
 0x151   :  { %v484_v24 = vadd.f32 %v483_v8, %v2390_v52  ;;  %v579_v51 = vpack.c.bf16 %v575_v39, %v571_v17  ;;  %v424_v26 = vpop.f32.mrb[20].mxu0  ;;  %v609_v27 = vmax.f32 %v2430_v6, 0.0  ;;  %v649_v28 = vmax.f32 %v2432_v7, 0.0  ;;  %v487_v30 = vpop.f32.mrb[20].mxu1  ;;  %v2062_v2 = vld [vmem:[#allocation10 + $0x1d8] sm:$0xff]   ;;  %v2066_v7 = vld [vmem:[#allocation10 + $0x1e0] sm:$0xff]  }
 0x152   :  { %v612_v61 = vmax.f32 %v604_v12, 0.0  ;;  %v652_v29 = vmax.f32 %v644_v22, 0.0  ;;  %v426_v20 = vpop.f32.mrb[21].mxu0  ;;  %v606_v31 = vadd.f32 %v482_v57, %v2398_v62  ;;  %v646_v48 = vadd.f32 %v482_v57, %v2378_v23  ;;  %v489_v33 = vpop.f32.mrb[21].mxu1  ;;  %v2064_v6 = vld [vmem:[#allocation10 + $0x198] sm:$0xff]   ;;  %v2067_v8 = vld [vmem:[#allocation10 + $0x120] sm:$0xff]  }
 0x153   :  { %v605_v49 = vadd.f32 %v421_v13, %v2403_v3  ;;  %v645_v52 = vadd.f32 %v421_v13, %v285_v14  ;;  %1524 = vmatprep.mubr.bf16.mxu1 %v579_v51  ;;  %v428_v32 = vpop.f32.mrb[22].mxu0  ;;  %v607_v36 = vadd.f32 %v484_v24, %v2409_v15  ;;  %v647_v37 = vadd.f32 %v484_v24, %v348_v55  ;;  %v491_v39 = vpop.f32.mrb[22].mxu1  ;;  %v2056_v3 = vld [vmem:[#allocation10 + $0x188] sm:$0xff]   ;;  %v2058_v15 = vld [vmem:[#allocation10 + $0x1d0] sm:$0xff]   ;;  %v2078_v22 = vld [vmem:[#allocation10 + $0x1f8] sm:$0xff]  }
 0x154   :  { %v2455_v34 = vpack.c.bf16 %v612_v61, %v608_v9  ;;  %v2457_v35 = vpack.c.bf16 %v652_v29, %v648_v56  ;;  %1525 = vmatmul.mubr.bf16.vlgmr.msra.gmra.mrb[24].mxu1 %v578_v43  ;;  %v430_v38 = vpop.f32.mrb[23].mxu0  ;;  %v614_v40 = vmax.f32 %v606_v31, 0.0  ;;  %v654_v62 = vmax.f32 %v646_v48, 0.0  ;;  %1917 = vmatpush3.bf16.msra.mxu0 %v2055_v21  ;;  %v493_v42 = vpop.f32.mrb[23].mxu1  ;;  %v2069_v14 = vld [vmem:[#allocation10 + $0x168] sm:$0xff]   ;;  %v2073_v17 = vld [vmem:[#allocation10 + $0x170] sm:$0xff]  }
 0x155   :  { %v613_v41 = vmax.f32 %v605_v49, 0.0  ;;  %v653_v23 = vmax.f32 %v645_v52, 0.0  ;;  %1937 = vmatpush3.bf16.msra.mxu1 %v2052_v50  ;;  %v611_v16 = vmax.f32 %v2437_v53, 0.0  ;;  %v651_v44 = vmax.f32 %v2439_v47, 0.0  ;;  %1918 = vmatprep.subr.bf16.mxu0 %v2057_v25  ;;  %v2068_v53 = vld [vmem:[#allocation10 + $0x1a0] sm:$0xff]   ;;  %v2070_v47 = vld [vmem:[#allocation10 + $0x1e8] sm:$0xff]  }
 0x156   :  { %v615_v45 = vmax.f32 %v607_v36, 0.0  ;;  %v655_v46 = vmax.f32 %v647_v37, 0.0  ;;  %1938 = vmatprep.subr.bf16.mxu1 %v2054_v19  ;;  %v2462_v43 = vpack.c.bf16 %v614_v40, %v610_v10  ;;  %v2464_v54 = vpack.c.bf16 %v654_v62, %v650_v11  ;;  %v2071_v55 = vld [vmem:[#allocation10 + $0x128] sm:$0xff]   ;;  %v2074_v56 = vld [vmem:[#allocation10 + $0x1f0] sm:$0xff]   ;;  %v2077_v11 = vld [vmem:[#allocation10 + $0x178] sm:$0xff]  }
 0x157   :  { %v617_v58 = vpack.c.bf16 %v613_v41, %v609_v27  ;;  %v657_v60 = vpack.c.bf16 %v653_v23, %v649_v28  ;;  %v2072_v9 = vld [vmem:[#allocation10 + $0x1a8] sm:$0xff]   ;;  %v2075_v10 = vld [vmem:[#allocation10 + $0x130] sm:$0xff]   ;;  %v2079_v50 = vld [vmem:[#allocation10 + $0x138] sm:$0xff]  }
 0x158   :  { %v619_v63 = vpack.c.bf16 %v615_v45, %v611_v16  ;;  %v659_v0 = vpack.c.bf16 %v655_v46, %v651_v44  ;;  %1919 = vmatpush3.bf16.msra.mxu0 %v2059_v59  ;;  %v2076_v12 = vld [vmem:[#allocation10 + $0x1b0] sm:$0xff]   ;;  %v2081_v57 = vld [vmem:[#allocation10 + $0x240] sm:$0xff]   ;;  %v2080_v13 = vld [vmem:[#allocation10 + $0x1b8] sm:$0xff]  }
 0x159   :  { %1939 = vmatpush3.bf16.msra.mxu1 %v2056_v3  ;;  %1565 = vmatprep.mubr.bf16.mxu0 %v617_v58  ;;  %v2082_v24 = vld [vmem:[#allocation10 + $0x2c0] sm:$0xff]   ;;  %v2085_v19 = vld [vmem:[#allocation10 + $0x248] sm:$0xff]   ;;  %v2089_v27 = vld [vmem:[#allocation10 + $0x250] sm:$0xff]  }
 0x15a   :  { %1940 = vmatprep.subr.bf16.mxu1 %v2058_v15  ;;  %1606 = vmatprep.mubr.bf16.mxu1 %v619_v63  ;;  %v2083_v51 = vld [vmem:[#allocation10 + $0x200] sm:$0xff]   ;;  %v2086_v25 = vld [vmem:[#allocation10 + $0x2c8] sm:$0xff]   ;;  %v2090_v61 = vld [vmem:[#allocation10 + $0x2d0] sm:$0xff]  }
 0x15b   :  { %1920 = vmatprep.subr.bf16.mxu0 %v2061_v18  ;;  %v2084_v21 = vld [vmem:[#allocation10 + $0x280] sm:$0xff]   ;;  %v2087_v26 = vld [vmem:[#allocation10 + $0x208] sm:$0xff]   ;;  %v2091_v29 = vld [vmem:[#allocation10 + $0x210] sm:$0xff]  }
 0x15c   :  { %1921 = vmatpush3.bf16.msra.mxu0 %v2063_v4  ;;  %v2088_v28 = vld [vmem:[#allocation10 + $0x288] sm:$0xff]   ;;  %v2093_v20 = vld [vmem:[#allocation10 + $0x258] sm:$0xff]   ;;  %v2092_v30 = vld [vmem:[#allocation10 + $0x290] sm:$0xff]  }
 0x15d   :  { %1941 = vmatpush3.bf16.msra.mxu1 %v2060_v1  ;;  %1922 = vmatprep.subr.bf16.mxu0 %v2065_v5  ;;  %v2094_v31 = vld [vmem:[#allocation10 + $0x2d8] sm:$0xff]   ;;  %v2097_v49 = vld [vmem:[#allocation10 + $0x260] sm:$0xff]   ;;  %v2102_v37 = vld [vmem:[#allocation10 + $0x2e8] sm:$0xff]  }
 0x15e   :  { %1942 = vmatprep.subr.bf16.mxu1 %v2062_v2  ;;  %v2095_v48 = vld [vmem:[#allocation10 + $0x218] sm:$0xff]   ;;  %v2098_v32 = vld [vmem:[#allocation10 + $0x2e0] sm:$0xff]   ;;  %v2103_v38 = vld [vmem:[#allocation10 + $0x228] sm:$0xff]  }
 0x15f   :  { %v2096_v52 = vld [vmem:[#allocation10 + $0x298] sm:$0xff]   ;;  %v2099_v33 = vld [vmem:[#allocation10 + $0x220] sm:$0xff]   ;;  %v2105_v39 = vld [vmem:[#allocation10 + $0x270] sm:$0xff]  }
 0x160   :  { %1923 = vmatpush3.bf16.msra.mxu0 %v2067_v8  ;;  %v2100_v36 = vld [vmem:[#allocation10 + $0x2a0] sm:$0xff]   ;;  %v2104_v40 = vld [vmem:[#allocation10 + $0x2a8] sm:$0xff]   ;;  %v2106_v62 = vld [vmem:[#allocation10 + $0x2f0] sm:$0xff]  }
 0x161   :  { %1943 = vmatpush3.bf16.msra.mxu1 %v2064_v6  ;;  %1924 = vmatprep.subr.bf16.mxu0 %v2069_v14  ;;  %v2107_v41 = vld [vmem:[#allocation10 + $0x230] sm:$0xff]   ;;  %v2109_v23 = vld [vmem:[#allocation10 + $0x278] sm:$0xff]   ;;  %v1773_v58 = vld [vmem:[%s2489_s4] ss:$0 sm:$0xff]  ;;  %s2248_s4 = smov [#allocation12]  }
 0x162   :  { %1944 = vmatprep.subr.bf16.mxu1 %v2066_v7  ;;  %v2108_v3 = vld [vmem:[#allocation10 + $0x2b0] sm:$0xff]   ;;  %v2110_v42 = vld [vmem:[#allocation10 + $0x2f8] sm:$0xff]   ;;  %s1728_s17 = sshll.u32 %s2248_s4, 4  ;;  %s1729_s17 = int_to_ptr.vmem [resolvable:$true] %s1728_s17 }
 0x163   :  { %v2111_v16 = vld [vmem:[#allocation10 + $0x238] sm:$0xff]   ;;  %s2209_s18 = scalar_lea.vmem %s1729_s17, 256  ;;  %p2214_p5 = scmp.lt.s32.totalorder %s1729_s17, %s1729_s17 }
 0x164   :  { %1925 = vmatpush3.bf16.msra.mxu0 %v2071_v55  ;;  %v2112_v44 = vld [vmem:[#allocation10 + $0x2b8] sm:$0xff]   ;;  %p2210_p4 = scmp.ne.s32.totalorder %s1729_s17, %s2209_s18  ;;  %p2215_p6 = scmp.lt.s32.totalorder %s2209_s18, %s2209_s18 }
 0x165   :  { %1945 = vmatpush3.bf16.msra.mxu1 %v2068_v53  ;;  %1926 = vmatprep.subr.bf16.mxu0 %v2073_v17 }
 0x166   :  { %1946 = vmatprep.subr.bf16.mxu1 %v2070_v47  ;;  %p2216_p7 = por %p2215_p6, %p2214_p5 }
 0x168   :  { %1927 = vmatpush3.bf16.msra.mxu0 %v2075_v10  ;;  %p2217_p8 = pnand %p2216_p7, %p2210_p4 }
 0x169   :  { %1947 = vmatpush3.bf16.msra.mxu1 %v2072_v9  ;;  %1928 = vmatprep.subr.bf16.mxu0 %v2077_v11 }
 0x16a   :  { %1948 = vmatprep.subr.bf16.mxu1 %v2074_v56 }
 0x16c   :  { %1929 = vmatpush3.bf16.msra.mxu0 %v2079_v50 }
 0x16d   :  { %1949 = vmatpush3.bf16.msra.mxu1 %v2076_v12  ;;  %1958 = vmatprep.subr.bf16.mxu0 %v2081_v57 }
 0x16e   :  { %1950 = vmatprep.subr.bf16.mxu1 %v2078_v22 }
 0x16f   :  { %1566 = vmatmul.mubr.bf16.vlgmr.msra.gmra.mrb[28].mxu0 %v2455_v34  ;;  %v2101_v34 = vld [vmem:[#allocation10 + $0x268] sm:$0xff]  }
 0x170   :  { %1959 = vmatpush3.bf16.msra.mxu0 %v2083_v51  ;;  %1647 = vmatprep.mubr.bf16.mxu0 %v657_v60 }
 0x171   :  { %1951 = vmatpush3.bf16.msra.mxu1 %v2080_v13  ;;  %1960 = vmatprep.subr.bf16.mxu0 %v2085_v19 }
 0x172   :  { %1980 = vmatprep.subr.bf16.mxu1 %v2082_v24 }
 0x174   :  { %1607 = vmatmul.mubr.bf16.vlgmr.msra.gmra.mrb[28].mxu1 %v2462_v43  ;;  %1961 = vmatpush3.bf16.msra.mxu0 %v2087_v26 }
 0x175   :  { %1981 = vmatpush3.bf16.msra.mxu1 %v2084_v21  ;;  %1688 = vmatprep.mubr.bf16.mxu1 %v659_v0 }
 0x176   :  { %1982 = vmatprep.subr.bf16.mxu1 %v2086_v25  ;;  %1962 = vmatprep.subr.bf16.mxu0 %v2089_v27 }
 0x178   :  { %1963 = vmatpush3.bf16.msra.mxu0 %v2091_v29 }
 0x179   :  { %1983 = vmatpush3.bf16.msra.mxu1 %v2088_v28  ;;  %1964 = vmatprep.subr.bf16.mxu0 %v2093_v20 }
 0x17a   :  { %1984 = vmatprep.subr.bf16.mxu1 %v2090_v61 }
 0x17c   :  { %1965 = vmatpush3.bf16.msra.mxu0 %v2095_v48 }
 0x17d   :  { %1985 = vmatpush3.bf16.msra.mxu1 %v2092_v30  ;;  %1966 = vmatprep.subr.bf16.mxu0 %v2097_v49 }
 0x17e   :  { %1986 = vmatprep.subr.bf16.mxu1 %v2094_v31 }
 0x180   :  { %1967 = vmatpush3.bf16.msra.mxu0 %v2099_v33 }
 0x181   :  { %1987 = vmatpush3.bf16.msra.mxu1 %v2096_v52  ;;  %1968 = vmatprep.subr.bf16.mxu0 %v2101_v34 }
 0x182   :  { %1988 = vmatprep.subr.bf16.mxu1 %v2098_v32 }
 0x184   :  { %1969 = vmatpush3.bf16.msra.mxu0 %v2103_v38 }
 0x185   :  { %1989 = vmatpush3.bf16.msra.mxu1 %v2100_v36  ;;  %1970 = vmatprep.subr.bf16.mxu0 %v2105_v39 }
 0x186   :  { %1990 = vmatprep.subr.bf16.mxu1 %v2102_v37 }
 0x188   :  { %1971 = vmatpush3.bf16.msra.mxu0 %v2107_v41 }
 0x189   :  { %1991 = vmatpush3.bf16.msra.mxu1 %v2104_v40  ;;  %1972 = vmatprep.subr.bf16.mxu0 %v2109_v23 }
 0x18a   :  { %1992 = vmatprep.subr.bf16.mxu1 %v2106_v62 }
 0x18c   :  { %1973 = vmatpush3.bf16.msra.mxu0 %v2111_v16 }
 0x18d   :  { %1993 = vmatpush3.bf16.msra.mxu1 %v2108_v3 }
 0x18e   :  { %1994 = vmatprep.subr.bf16.mxu1 %v2110_v42 }
 0x18f   :  { %1648 = vmatmul.mubr.bf16.vlgmr.msra.gmra.mrb[32].mxu0 %v2457_v35 }
 0x191   :  { %1995 = vmatpush3.bf16.msra.mxu1 %v2112_v44 }
 0x194   :  { %1689 = vmatmul.mubr.bf16.vlgmr.msra.gmra.mrb[32].mxu1 %v2464_v54 }
 0x221   :  { %v1886_v45 = vpop.f32.mrb[24].mxu0 }
 0x222   :  { %v1887_v46 = vpop.f32.mrb[25].mxu0 }
 0x223   :  { %v1888_v15 = vadd.f32 %v1887_v46, %v1886_v45  ;;  %v1889_v43 = vpop.f32.mrb[26].mxu0 }
 0x224   :  { %v1890_v59 = vpop.f32.mrb[27].mxu0 }
 0x225   :  { %v1891_v60 = vadd.f32 %v1890_v59, %v1889_v43  ;;  %v1486_v18 = vadd.f32 %v1888_v15, %v1773_v58 }
 0x227   :  { %v1908_v63 = vpop.f32.mrb[24].mxu1  ;;  %v1489_v4 = vadd.f32 %v1891_v60, %v1773_v58 }
 0x228   :  { %v1909_v0 = vpop.f32.mrb[25].mxu1 }
 0x229   :  { %v1910_v1 = vadd.f32 %v1909_v0, %v1908_v63  ;;  %v1911_v2 = vpop.f32.mrb[26].mxu1 }
 0x22a   :  { %v1912_v5 = vpop.f32.mrb[27].mxu1 }
 0x22b   :  { %v1527_v35 = vadd.f32 %v1910_v1, %v1486_v18  ;;  %v1913_v6 = vadd.f32 %v1912_v5, %v1911_v2 }
 0x22d   :  { %v1530_v54 = vadd.f32 %v1913_v6, %v1489_v4 }
 0x242   :  { %v1930_v7 = vpop.f32.mrb[28].mxu0 }
 0x243   :  { %v1931_v8 = vpop.f32.mrb[29].mxu0 }
 0x244   :  { %v1932_v53 = vadd.f32 %v1931_v8, %v1930_v7  ;;  %v1933_v47 = vpop.f32.mrb[30].mxu0 }
 0x245   :  { %v1934_v17 = vpop.f32.mrb[31].mxu0 }
 0x246   :  { %v1568_v9 = vadd.f32 %v1932_v53, %v1527_v35  ;;  %v1935_v11 = vadd.f32 %v1934_v17, %v1933_v47 }
 0x247   :  { %v1952_v14 = vpop.f32.mrb[28].mxu1 }
 0x248   :  { %v1953_v55 = vpop.f32.mrb[29].mxu1  ;;  %v1571_v50 = vadd.f32 %v1935_v11, %v1530_v54 }
 0x249   :  { %v1954_v56 = vadd.f32 %v1953_v55, %v1952_v14  ;;  %v1955_v10 = vpop.f32.mrb[30].mxu1 }
 0x24a   :  { %v1956_v12 = vpop.f32.mrb[31].mxu1 }
 0x24b   :  { %v1609_v22 = vadd.f32 %v1954_v56, %v1568_v9  ;;  %v1957_v57 = vadd.f32 %v1956_v12, %v1955_v10 }
 0x24d   :  { %v1612_v13 = vadd.f32 %v1957_v57, %v1571_v50 }
 0x262   :  { %v1974_v24 = vpop.f32.mrb[32].mxu0 }
 0x263   :  { %v1975_v51 = vpop.f32.mrb[33].mxu0 }
 0x264   :  { %v1976_v21 = vadd.f32 %v1975_v51, %v1974_v24  ;;  %v1977_v25 = vpop.f32.mrb[34].mxu0 }
 0x265   :  { %v1978_v27 = vpop.f32.mrb[35].mxu0 }
 0x266   :  { %v1650_v28 = vadd.f32 %v1976_v21, %v1609_v22  ;;  %v1979_v20 = vadd.f32 %v1978_v27, %v1977_v25 }
 0x267   :  { %v1996_v19 = vpop.f32.mrb[32].mxu1 }
 0x268   :  { %v1997_v26 = vpop.f32.mrb[33].mxu1  ;;  %v1653_v31 = vadd.f32 %v1979_v20, %v1612_v13 }
 0x269   :  { %v1998_v61 = vadd.f32 %v1997_v26, %v1996_v19  ;;  %v1999_v29 = vpop.f32.mrb[34].mxu1 }
 0x26a   :  { %v2000_v30 = vpop.f32.mrb[35].mxu1 }
 0x26b   :  { %v2001_v48 = vadd.f32 %v2000_v30, %v1999_v29  ;;  %v1691_v49 = vadd.f32 %v1998_v61, %v1650_v28 }
 0x26d   :  { %1697 = vmax.xlane.f32.xlu0 %v1691_v49  ;;  %v1694_v52 = vadd.f32 %v2001_v48, %v1653_v31 }
 0x271   :  { %1699 = vmax.xlane.f32.xlu0 %v1694_v52 }
 0x2fa   :  { %v1698_v32 = vpop.xlane.xlu0 %1697 }
 0x2fb   :  { %v1701_v33 = vsub.f32 %v1691_v49, %v1698_v32 }
 0x2fd   :  { %v1703_v34 = vmul.f32 1.442695, %v1701_v33 }
 0x2fe   :  { %v1700_v36 = vpop.xlane.xlu0 %1699 }
 0x2ff   :  { %2113 = vpow2.f32 %v1703_v34  ;;  %v1702_v37 = vsub.f32 %v1694_v52, %v1700_v36 }
 0x301   :  { %v1705_v38 = vmul.f32 1.442695, %v1702_v37 }
 0x303   :  { %2115 = vpow2.f32 %v1705_v38 }
 0x309   :  { %v2114_v39 = vpop.eup %2113 }
 0x30a   :  { %1707 = vadd.xlane.f32.xlu1 %v2114_v39 }
 0x30d   :  { %v2116_v40 = vpop.eup %2115 }
 0x30e   :  { %1709 = vadd.xlane.f32.xlu1 %v2116_v40 }
 0x397   :  { %v1708_v62 = vpop.xlane.xlu1 %1707 }
 0x398   :  { %2117 = vrcp.f32 %v1708_v62 }
 0x39b   :  { %v1710_v41 = vpop.xlane.xlu1 %1709 }
 0x39c   :  { %2119 = vrcp.f32 %v1710_v41 }
 0x3a2   :  { %v2118_v23 = vpop.eup %2117 }
 0x3a3   :  { %v1713_v3 = vmul.f32 %v2118_v23, %v1708_v62 }
 0x3a5   :  { %v1715_v42 = vsub.f32 2.0, %v1713_v3 }
 0x3a6   :  { %v2120_v16 = vpop.eup %2119 }
 0x3a7   :  { %v1717_v44 = vmul.f32 %v2118_v23, %v1715_v42  ;;  %v1714_v45 = vmul.f32 %v2120_v16, %v1710_v41 }
 0x3a9   :  { %v1719_v46 = vmul.f32 %v2114_v39, %v1717_v44  ;;  %v1716_v15 = vsub.f32 2.0, %v1714_v45 }
 0x3ab   :  { %1721 = vst [vmem:[#allocation12] sm:$0xff] %v1719_v46  ;;  %v1718_v43 = vmul.f32 %v2120_v16, %v1716_v15 }
 0x3ad   :  { %v1720_v58 = vmul.f32 %v2116_v40, %v1718_v43 }
 0x3af   :  { %1722 = vst [vmem:[#allocation12 + $0x8] sm:$0xff] %v1720_v58 }
 0x3b0   :  { %2220 = shalt.err (!%p2217_p8)
}
 0x3b1   :  { %s2221_s21 = scalar_lea.hbm %s2490_s5, 256 }
 0x3b2   :  { %p2222_p9 = scmp.ne.s32.totalorder %s2490_s5, %s2221_s21  ;;  %p2225_p10 = scmp.lt.u32.totalorder %s2221_s21, %s2490_s5 }
 0x3b4   :  { %p2227_p11 = pnand %p2225_p10, %p2222_p9 }
 0x3b6   :  { %2230 = shalt.err (!%p2227_p11)
}
 0x3b7   :  { %s2249_s26 = smov 128   ;;  %s2250_s27 = smov 8  }
 0x3b8   :  { %1734 = dma.vmem_to_hbm [thread:$0]  %s1729_s17, 256, %s2490_s5, [#allocation6], %s2249_s26, %s2249_s26, %s2250_s27  }
 0x3b9   :  { %2237 = dma.done.wait [#allocation6], 256  }
 0x3ba   :  { %2238 = vsyncadd [#allocation6], 4294967040 }
 0x3bb   :  { %1738 = vsyncpa [#allocation5], 1 }
 0x3bc   :  { %1739 = vsyncpa [#allocation8], 1 }
 0x3bd   :  { %1740 = vsyncpa [#allocation11], 1 }
 0x3be   :  { %1741 = vsyncpa [#allocation6], 1 }

</bundles_post_ra>
